<compile_context>
chip_gen: v7x
topology: tpu7x:2x2x1
jax: 0.10.0
libtpu: 0.0.40
codegen_flags: <defaults>
</compile_context>

<pallas_src>
import functools

import jax
import jax.numpy as jnp
from jax.experimental import pallas as pl
from jax.experimental.pallas import tpu as pltpu

TASK = "binary"   # config.config['task'] in the reference code (binary -> sigmoid)


def _bdot(a, b):
    """bf16 x bf16 -> f32 matmul (mirrors the kernel's MXU precision choice)."""
    return jnp.dot(a.astype(jnp.bfloat16), b.astype(jnp.bfloat16),
                   preferred_element_type=jnp.float32)


# ----------------------------------------------------------------------------- forward
def deepgbm_forward(params, Xg, Xd, *, tb=2048):
    """DeepGBM.forward -> (out, gbdt2nn_pred), computed by one fused Pallas kernel."""
    f32, bf16 = jnp.float32, jnp.bfloat16
    hi = jax.lax.Precision.HIGHEST
    Xd = Xd.astype(jnp.int32)                                   # Xd = Xd.long()
    B = Xg.shape[0]
    F = Xd.shape[1]
    NUME = Xg.shape[1]

    # ---- categorical embedding gathers (data-dependent -> stay in XLA) ----------------
    # TODO(synk): emb1/emb2 index gathers have no rectangular BlockSpec form; they could
    # later move in-kernel as a one-hot matmul over the (small) vocab.
    fidx = jnp.arange(F, dtype=jnp.int32)[None, :]
    fm1 = params["emb1"][fidx, Xd].astype(f32)                  # (B, F)   first-order emb
    v = params["emb2"][fidx, Xd].astype(f32)                    # (B, F, K) second-order emb
    K = v.shape[-1]
    FK = F * K
    deep = v.reshape(B, FK)
    IN_W = NUME + FK + F
    # One streamed bf16 slab: [raw numeric | flattened 2nd-order emb | 1st-order emb]
    x_in = jnp.concatenate([Xg.astype(f32), deep, fm1], axis=1).astype(bf16)   # (B, IN_W)

    # ---- fold everything static into resident weights ---------------------------------
    w1, b1, w2, b2, w3, b3 = (params[k] for k in ("w1", "b1", "w2", "b2", "w3", "b3"))
    d1, db1, d2, db2 = (params[k] for k in ("d1", "db1", "d2", "db2"))
    out_w, out_b = params["out_w"], params["out_b"]
    T1, T2 = w1.shape[1], w2.shape[1]
    D1, D2 = d1.shape[1], d2.shape[1]
    EMB = w3.shape[1]
    DIN = w1.shape[0]
    HF1, HF2 = T1 + D1, T2 + D2
    OUT_W = ((EMB + 2 + 63) // 64) * 64             # lane-padded payload width (64 here)

    # Fold the static `used_features` gather into w1: xg @ w1 == Xg @ (Sel @ w1).
    used_flat = params["used_features"].reshape(-1).astype(jnp.int32)
    sel = jnp.zeros((NUME, DIN), f32).at[used_flat, jnp.arange(DIN)].set(1.0)
    w1g = jnp.dot(sel, w1, precision=hi)                         # (NUME, T1)

    # Block-diagonal fusion of (GBDT tree MLP || CatNN deep MLP).
    w1f = (jnp.zeros((IN_W, HF1), f32)
           .at[:NUME, :T1].set(w1g)
           .at[NUME:NUME + FK, T1:].set(d1))
    b1f = jnp.concatenate([b1, db1], axis=1)
    w2f = (jnp.zeros((HF1, HF2), f32)
           .at[:T1, :T2].set(w2)
           .at[T1:, T2:].set(d2))
    b2f = jnp.concatenate([b2, db2], axis=1)

    # FM side columns folded into the FIRST matmul: [sum_f v_{f,k} | sum_f fm1_f].
    sm = (jnp.zeros((IN_W, K + 1), f32)
          .at[NUME + jnp.arange(FK), jnp.arange(FK) % K].set(1.0)
          .at[NUME + FK:, K].set(1.0))
    w1e = jnp.concatenate([w1f, sm], axis=1).astype(bf16)        # (IN_W, HF1+K+1)
    w2b = w2f.astype(bf16)

    # Extended head: [leaf emb | folded gbdt scalar head | CatNN deep lane-sum | zero pad].
    w3e = (jnp.zeros((HF2, OUT_W), f32)
           .at[:T2, :EMB].set(w3)
           .at[:T2, EMB].set(jnp.dot(w3, out_w, precision=hi)[:, 0])
           .at[T2:, EMB + 1].set(1.0)).astype(bf16)
    b3e = (jnp.zeros((1, OUT_W), f32)
           .at[:, :EMB].set(b3)
           .at[0, EMB].set((jnp.dot(b3, out_w, precision=hi) + out_b)[0, 0]))

    # Scalars -> SMEM.
    sc = jnp.stack([jnp.asarray(params["alpha"], f32),
                    jnp.asarray(params["beta"], f32),
                    jnp.asarray(params["cat_bias"], f32).reshape(()),
                    jnp.float32(0.0)]).reshape(1, 4)

    # ---- batch tiling ------------------------------------------------------------------
    tb = max(16, (int(tb) // 16) * 16)              # bf16-sublane friendly tile rows
    bmin = -(-B // 16) * 16
    if bmin >= 32:
        # keep at least 2 grid steps so a v7x megacore can shard the batch axis
        tb = min(tb, -(-(bmin // 2) // 16) * 16)
    else:
        tb = min(tb, bmin)
    Bp = -(-B // tb) * tb
    if Bp != B:
        x_in = jnp.pad(x_in, ((0, Bp - B), (0, 0)))
    grid = (Bp // tb,)

    def kernel(sc_ref, x_ref, w1_ref, b1_ref, w2_ref, b2_ref, w3_ref, b3_ref, out_ref):
        xb = x_ref[...]                                                      # (tb, IN_W) bf16
        # Fused (GBDT MLP || CatNN deep MLP || FM side sums): bf16 MXU, f32 accumulate.
        t0 = jnp.dot(xb, w1_ref[...], preferred_element_type=jnp.float32)   # (tb, HF1+K+1)
        side = t0[:, HF1:]                                                   # FM side columns
        h = jnp.maximum(t0[:, :HF1] + b1_ref[...], 0.0).astype(jnp.bfloat16)
        h = jnp.maximum(jnp.dot(h, w2_ref[...], preferred_element_type=jnp.float32)
                        + b2_ref[...], 0.0).astype(jnp.bfloat16)
        e = jnp.dot(h, w3_ref[...], preferred_element_type=jnp.float32) + b3_ref[...]

        gbdt_out = e[:, EMB:EMB + 1]             # emb @ output_w + output_b (folded head)
        deep_sum = e[:, EMB + 1:EMB + 2]         # sum over CatNN deep-MLP outputs (folded)

        sv = side[:, :K]                         # sum_f v_{f,k}
        fm_first = side[:, K:K + 1]              # first-order FM term
        xd = xb[:, NUME:NUME + FK].astype(jnp.float32)     # only the deep lanes, f32
        sq_sum = jnp.sum(xd * xd, axis=-1, keepdims=True)
        fm_second = 0.5 * (jnp.sum(sv * sv, axis=-1, keepdims=True) - sq_sum)

        alpha, beta, cat_bias = sc_ref[0, 0], sc_ref[0, 1], sc_ref[0, 2]
        combined = alpha * gbdt_out + beta * (fm_first + fm_second + deep_sum + cat_bias)
        if TASK == "binary":
            combined = jax.nn.sigmoid(combined)

        # Single store: leaf embedding in lanes [0, EMB), combined prediction at lane EMB.
        lane = jax.lax.broadcasted_iota(jnp.int32, (tb, OUT_W), 1)
        out_ref[...] = jnp.where(lane == EMB, combined, e)

    flops = 2 * Bp * (IN_W * (HF1 + K + 1) + HF1 * HF2 + HF2 * OUT_W)
    bytes_accessed = (x_in.size * 2 + Bp * OUT_W * 4 +
                      2 * (w1e.size + w2b.size + w3e.size) +
                      4 * (b1f.size + b2f.size + b3e.size + sc.size))

    full = lambda a: pl.BlockSpec(a.shape, lambda i, _n=a.ndim: (0,) * _n)  # resident weights

    slab = pl.pallas_call(
        kernel,
        out_shape=jax.ShapeDtypeStruct((Bp, OUT_W), f32),
        grid=grid,
        in_specs=[
            pl.BlockSpec((1, 4), lambda i: (0, 0), memory_space=pltpu.MemorySpace.SMEM),
            pl.BlockSpec((tb, IN_W), lambda i: (i, 0)),          # streamed activation slab
            full(w1e), full(b1f), full(w2b), full(b2f), full(w3e), full(b3e),
        ],
        out_specs=pl.BlockSpec((tb, OUT_W), lambda i: (i, 0)),
        compiler_params=pltpu.CompilerParams(dimension_semantics=("parallel",)),
        cost_estimate=pl.CostEstimate(flops=flops, transcendentals=Bp,
                                      bytes_accessed=bytes_accessed),
    )(sc, x_in, w1e, b1f, w2b, b2f, w3e, b3e)

    out = slab[:B, EMB]                          # combined prediction, shape (B,)
    emb_pred = slab[:B, :EMB]                    # gbdt2nn_pred (leaf-embedding prediction)
    return out, emb_pred


# ----------------------------------------------------------------------------- params
def init_params(key, *, nume_input_size=16, n_models=4, n_used=8,
                tree_layers=(32, 32), embsize=8,
                cate_field_size=8, cat_vocab=10, cat_embedding_size=4,
                deep_layers=(32, 32)):
    keys = jax.random.split(key, 16)

    def dense(k, shape):
        return jax.random.normal(k, shape, jnp.float32) * 0.1

    din = n_models * n_used
    emb_total = n_models * embsize
    used_features = (jnp.arange(n_models * n_used, dtype=jnp.int32)
                     % nume_input_size).reshape(n_models, n_used)

    return dict(
        alpha=1.0, beta=0.0,                       # Parameter(0)+1, Parameter(0)
        used_features=used_features,
        # GBDT2NN
        w1=dense(keys[0], (din, tree_layers[0])),           b1=dense(keys[1], (1, tree_layers[0])),
        w2=dense(keys[2], (tree_layers[0], tree_layers[1])), b2=dense(keys[3], (1, tree_layers[1])),
        w3=dense(keys[4], (tree_layers[1], emb_total)),      b3=dense(keys[5], (1, emb_total)),
        out_w=dense(keys[6], (emb_total, 1)),                out_b=dense(keys[7], (1, 1)),
        # CatNN (uniform vocab so tables can be stacked)
        emb1=dense(keys[8], (cate_field_size, cat_vocab)),
        emb2=dense(keys[9], (cate_field_size, cat_vocab, cat_embedding_size)),
        d1=dense(keys[10], (cate_field_size * cat_embedding_size, deep_layers[0])),
        db1=dense(keys[11], (1, deep_layers[0])),
        d2=dense(keys[12], (deep_layers[0], deep_layers[1])),
        db2=dense(keys[13], (1, deep_layers[1])),
        cat_bias=dense(keys[14], (1, 1)),
    )


# ----------------------------------------------------------------------------- reference
def deepgbm_reference(params, Xg, Xd):
    """Pure-JAX reference with the same bf16 activation/weight quantization as the kernel."""
    f32, bf16 = jnp.float32, jnp.bfloat16
    Xd = Xd.astype(jnp.int32)
    B, F = Xd.shape
    fidx = jnp.arange(F)[None, :]
    used_flat = params["used_features"].reshape(-1)

    # streamed-activation quantization (bf16 slab), matching the kernel
    xgq = Xg.astype(bf16).astype(f32)
    fm1 = params["emb1"][fidx, Xd].astype(bf16).astype(f32)
    v = params["emb2"][fidx, Xd].astype(bf16).astype(f32)
    K = v.shape[-1]
    deep = v.reshape(B, F * K)

    xg = xgq[:, used_flat]
    h = jax.nn.relu(_bdot(xg, params["w1"]) + params["b1"])
    h = jax.nn.relu(_bdot(h, params["w2"]) + params["b2"])
    emb = _bdot(h, params["w3"]) + params["b3"]
    gbdt_out = (_bdot(emb, params["out_w"]) + params["out_b"]).reshape(-1)

    sum_v = v.sum(axis=1)
    fm2 = 0.5 * (sum_v ** 2 - (v * v).sum(axis=1))
    xd_ = jax.nn.relu(_bdot(deep, params["d1"]) + params["db1"])
    xd_ = jax.nn.relu(_bdot(xd_, params["d2"]) + params["db2"])
    cat_out = fm1.sum(1) + fm2.sum(1) + xd_.sum(1) + params["cat_bias"][0, 0]

    out = (jnp.asarray(params["alpha"], f32) * gbdt_out
           + jnp.asarray(params["beta"], f32) * cat_out)
    if TASK == "binary":
        out = jax.nn.sigmoid(out)
    return out, emb


# ----------------------------------------------------------------------------- main
if __name__ == "__main__":
    key = jax.random.PRNGKey(0)
    kp, kx, kd = jax.random.split(key, 3)

    params = init_params(kp)
    B = 64
    Xg = jax.random.normal(kx, (B, 16), jnp.float32)                     # numeric features
    Xd = jax.random.randint(kd, (B, 8), 0, 10, dtype=jnp.int32)          # categorical indices

    # small tile so the demo exercises a multi-step (grid=2) pipelined launch
    fwd = jax.jit(functools.partial(deepgbm_forward, tb=32))

    out, emb_pred = fwd(params, Xg, Xd)
    jax.block_until_ready((out, emb_pred))

    ref_out, ref_emb = deepgbm_reference(params, Xg, Xd)
    assert out.shape == (B,) and emb_pred.shape == ref_emb.shape
    # bf16 weights/activations feed the MXU in both paths; tolerance covers the folded-head
    # reassociation and weight-fusion quantization differences (a few e-4 measured).
    assert jnp.allclose(out, ref_out, atol=5e-3, rtol=5e-3), \
        float(jnp.max(jnp.abs(out - ref_out)))
    assert jnp.allclose(emb_pred, ref_emb, atol=5e-3, rtol=5e-3), \
        float(jnp.max(jnp.abs(emb_pred - ref_emb)))

    # also exercise the CatNN (DeepFM) branch with a nonzero beta
    p2 = dict(params, alpha=0.7, beta=0.3)
    out2, emb2 = fwd(p2, Xg, Xd)
    jax.block_until_ready((out2, emb2))
    r_out2, r_emb2 = deepgbm_reference(p2, Xg, Xd)
    assert jnp.allclose(out2, r_out2, atol=5e-3, rtol=5e-3), \
        float(jnp.max(jnp.abs(out2 - r_out2)))
    assert jnp.allclose(emb2, r_emb2, atol=5e-3, rtol=5e-3)

    print("KERNEL_OK")
</pallas_src>

<mosaic_0001>
module attributes {stable_mosaic.version = 11 : i64} {
  func.func @kernel(%arg0: i32, %arg1: memref<1x4xf32, #tpu.memory_space<smem>>, %arg2: memref<32x56xbf16, #tpu.memory_space<vmem>>, %arg3: memref<56x69xbf16, #tpu.memory_space<vmem>>, %arg4: memref<1x64xf32, #tpu.memory_space<vmem>>, %arg5: memref<64x64xbf16, #tpu.memory_space<vmem>>, %arg6: memref<1x64xf32, #tpu.memory_space<vmem>>, %arg7: memref<64x64xbf16, #tpu.memory_space<vmem>>, %arg8: memref<1x64xf32, #tpu.memory_space<vmem>>, %arg9: memref<32x64xf32, #tpu.memory_space<vmem>>) attributes {dimension_semantics = [#tpu.dimension_semantics<parallel>], iteration_bounds = array<i64: 2>, scalar_prefetch = 0 : i64, scratch_operands = 0 : i64, tpu.core_type = #tpu.core_type<tc>, window_params = [{transform_indices = @transform_0, window_bounds = array<i64: 1, 4>}, {transform_indices = @transform_1, window_bounds = array<i64: 32, 56>}, {pipeline_mode = #tpu.pipeline_mode<synchronous>, transform_indices = @transform_2, window_bounds = array<i64: 56, 69>}, {pipeline_mode = #tpu.pipeline_mode<synchronous>, transform_indices = @transform_3, window_bounds = array<i64: 1, 64>}, {pipeline_mode = #tpu.pipeline_mode<synchronous>, transform_indices = @transform_4, window_bounds = array<i64: 64, 64>}, {pipeline_mode = #tpu.pipeline_mode<synchronous>, transform_indices = @transform_5, window_bounds = array<i64: 1, 64>}, {pipeline_mode = #tpu.pipeline_mode<synchronous>, transform_indices = @transform_6, window_bounds = array<i64: 64, 64>}, {pipeline_mode = #tpu.pipeline_mode<synchronous>, transform_indices = @transform_7, window_bounds = array<i64: 1, 64>}, {transform_indices = @transform_8, window_bounds = array<i64: 32, 64>}]} {
    %c0 = arith.constant 0 : index
    %c0_0 = arith.constant 0 : index
    %0 = vector.load %arg2[%c0, %c0_0] : memref<32x56xbf16, #tpu.memory_space<vmem>>, vector<32x56xbf16>
    %c0_1 = arith.constant 0 : index
    %c0_2 = arith.constant 0 : index
    %1 = vector.load %arg3[%c0_1, %c0_2] : memref<56x69xbf16, #tpu.memory_space<vmem>>, vector<56x69xbf16>
    %cst = arith.constant dense<0.000000e+00> : vector<32x69xf32>
    %2 = tpu.matmul %0, %1, %cst {dimension_numbers = #tpu.dot_dimension_numbers<[1], [0], [0], [1], [0, 0, 1, 1], [], []>} : vector<32x56xbf16>, vector<56x69xbf16>, vector<32x69xf32> -> vector<32x69xf32>
    %3 = vector.extract_strided_slice %2 {offsets = [0, 64], sizes = [32, 5], strides = [1, 1]} : vector<32x69xf32> to vector<32x5xf32>
    %4 = vector.extract_strided_slice %2 {offsets = [0, 0], sizes = [32, 64], strides = [1, 1]} : vector<32x69xf32> to vector<32x64xf32>
    %c0_3 = arith.constant 0 : index
    %c0_4 = arith.constant 0 : index
    %5 = vector.load %arg4[%c0_3, %c0_4] : memref<1x64xf32, #tpu.memory_space<vmem>>, vector<1x64xf32>
    %6 = vector.broadcast %5 : vector<1x64xf32> to vector<32x64xf32>
    %7 = arith.addf %4, %6 : vector<32x64xf32>
    %cst_5 = arith.constant 0.000000e+00 : f32
    %8 = vector.broadcast %cst_5 : f32 to vector<32x64xf32>
    %9 = arith.maximumf %7, %8 : vector<32x64xf32>
    %10 = arith.truncf %9 : vector<32x64xf32> to vector<32x64xbf16>
    %c0_6 = arith.constant 0 : index
    %c0_7 = arith.constant 0 : index
    %11 = vector.load %arg5[%c0_6, %c0_7] : memref<64x64xbf16, #tpu.memory_space<vmem>>, vector<64x64xbf16>
    %cst_8 = arith.constant dense<0.000000e+00> : vector<32x64xf32>
    %12 = tpu.matmul %10, %11, %cst_8 {dimension_numbers = #tpu.dot_dimension_numbers<[1], [0], [0], [1], [0, 0, 1, 1], [], []>} : vector<32x64xbf16>, vector<64x64xbf16>, vector<32x64xf32> -> vector<32x64xf32>
    %c0_9 = arith.constant 0 : index
    %c0_10 = arith.constant 0 : index
    %13 = vector.load %arg6[%c0_9, %c0_10] : memref<1x64xf32, #tpu.memory_space<vmem>>, vector<1x64xf32>
    %14 = vector.broadcast %13 : vector<1x64xf32> to vector<32x64xf32>
    %15 = arith.addf %12, %14 : vector<32x64xf32>
    %cst_11 = arith.constant 0.000000e+00 : f32
    %16 = vector.broadcast %cst_11 : f32 to vector<32x64xf32>
    %17 = arith.maximumf %15, %16 : vector<32x64xf32>
    %18 = arith.truncf %17 : vector<32x64xf32> to vector<32x64xbf16>
    %c0_12 = arith.constant 0 : index
    %c0_13 = arith.constant 0 : index
    %19 = vector.load %arg7[%c0_12, %c0_13] : memref<64x64xbf16, #tpu.memory_space<vmem>>, vector<64x64xbf16>
    %cst_14 = arith.constant dense<0.000000e+00> : vector<32x64xf32>
    %20 = tpu.matmul %18, %19, %cst_14 {dimension_numbers = #tpu.dot_dimension_numbers<[1], [0], [0], [1], [0, 0, 1, 1], [], []>} : vector<32x64xbf16>, vector<64x64xbf16>, vector<32x64xf32> -> vector<32x64xf32>
    %c0_15 = arith.constant 0 : index
    %c0_16 = arith.constant 0 : index
    %21 = vector.load %arg8[%c0_15, %c0_16] : memref<1x64xf32, #tpu.memory_space<vmem>>, vector<1x64xf32>
    %22 = vector.broadcast %21 : vector<1x64xf32> to vector<32x64xf32>
    %23 = arith.addf %20, %22 : vector<32x64xf32>
    %24 = vector.extract_strided_slice %23 {offsets = [0, 32], sizes = [32, 1], strides = [1, 1]} : vector<32x64xf32> to vector<32x1xf32>
    %25 = vector.extract_strided_slice %23 {offsets = [0, 33], sizes = [32, 1], strides = [1, 1]} : vector<32x64xf32> to vector<32x1xf32>
    %26 = vector.extract_strided_slice %3 {offsets = [0, 0], sizes = [32, 4], strides = [1, 1]} : vector<32x5xf32> to vector<32x4xf32>
    %27 = vector.extract_strided_slice %3 {offsets = [0, 4], sizes = [32, 1], strides = [1, 1]} : vector<32x5xf32> to vector<32x1xf32>
    %28 = vector.extract_strided_slice %0 {offsets = [0, 16], sizes = [32, 32], strides = [1, 1]} : vector<32x56xbf16> to vector<32x32xbf16>
    %29 = arith.extf %28 : vector<32x32xbf16> to vector<32x32xf32>
    %30 = arith.mulf %29, %29 : vector<32x32xf32>
    %cst_17 = arith.constant dense<0.000000e+00> : vector<32xf32>
    %31 = vector.multi_reduction <add>, %30, %cst_17 [1] : vector<32x32xf32> to vector<32xf32>
    %32 = vector.shape_cast %31 : vector<32xf32> to vector<32x1xf32>
    %33 = arith.mulf %26, %26 : vector<32x4xf32>
    %cst_18 = arith.constant dense<0.000000e+00> : vector<32xf32>
    %34 = vector.multi_reduction <add>, %33, %cst_18 [1] : vector<32x4xf32> to vector<32xf32>
    %35 = vector.shape_cast %34 : vector<32xf32> to vector<32x1xf32>
    %36 = arith.subf %35, %32 : vector<32x1xf32>
    %cst_19 = arith.constant 5.000000e-01 : f32
    %37 = vector.broadcast %cst_19 : f32 to vector<32x1xf32>
    %38 = arith.mulf %37, %36 : vector<32x1xf32>
    %c0_20 = arith.constant 0 : index
    %c0_21 = arith.constant 0 : index
    %39 = memref.load %arg1[%c0_20, %c0_21] : memref<1x4xf32, #tpu.memory_space<smem>>
    %c0_22 = arith.constant 0 : index
    %c1 = arith.constant 1 : index
    %40 = memref.load %arg1[%c0_22, %c1] : memref<1x4xf32, #tpu.memory_space<smem>>
    %c0_23 = arith.constant 0 : index
    %c2 = arith.constant 2 : index
    %41 = memref.load %arg1[%c0_23, %c2] : memref<1x4xf32, #tpu.memory_space<smem>>
    %42 = vector.broadcast %39 : f32 to vector<32x1xf32>
    %43 = arith.mulf %42, %24 : vector<32x1xf32>
    %44 = arith.addf %27, %38 : vector<32x1xf32>
    %45 = arith.addf %44, %25 : vector<32x1xf32>
    %46 = vector.broadcast %41 : f32 to vector<32x1xf32>
    %47 = arith.addf %45, %46 : vector<32x1xf32>
    %48 = vector.broadcast %40 : f32 to vector<32x1xf32>
    %49 = arith.mulf %48, %47 : vector<32x1xf32>
    %50 = arith.addf %43, %49 : vector<32x1xf32>
    %51 = arith.negf %50 : vector<32x1xf32>
    %52 = math.exp %51 : vector<32x1xf32>
    %cst_24 = arith.constant 1.000000e+00 : f32
    %53 = vector.broadcast %cst_24 : f32 to vector<32x1xf32>
    %54 = arith.addf %53, %52 : vector<32x1xf32>
    %55 = arith.divf %53, %54 : vector<32x1xf32>
    %56 = tpu.iota {dimensions = array<i32: 1>} : vector<32x64xi32>
    %c32_i32 = arith.constant 32 : i32
    %57 = vector.broadcast %c32_i32 : i32 to vector<32x64xi32>
    %58 = arith.cmpi eq, %56, %57 : vector<32x64xi32>
    %59 = vector.shape_cast %55 : vector<32x1xf32> to vector<32x1xf32>
    %60 = vector.broadcast %59 : vector<32x1xf32> to vector<32x64xf32>
    %61 = arith.select %58, %60, %23 : vector<32x64xi1>, vector<32x64xf32>
    %c0_25 = arith.constant 0 : index
    %c0_26 = arith.constant 0 : index
    %62 = vector.load %arg9[%c0_25, %c0_26] : memref<32x64xf32, #tpu.memory_space<vmem>>, vector<32x64xf32>
    tpu.vector_store %arg9[%c0_25, %c0_26], %61 {strides = array<i32>} : memref<32x64xf32, #tpu.memory_space<vmem>>, vector<32x64xf32>,
    return
  }
  func.func @transform_0(%arg0: i32) -> (i32, i32) {
    %c0_i32 = arith.constant 0 : i32
    %c0_i32_0 = arith.constant 0 : i32
    %c0_i32_1 = arith.constant 0 : i32
    return %c0_i32, %c0_i32_0 : i32, i32
  }
  func.func @transform_1(%arg0: i32) -> (i32, i32) {
    %c0_i32 = arith.constant 0 : i32
    %c0_i32_0 = arith.constant 0 : i32
    return %arg0, %c0_i32 : i32, i32
  }
  func.func @transform_2(%arg0: i32) -> (i32, i32) {
    %c0_i32 = arith.constant 0 : i32
    %c0_i32_0 = arith.constant 0 : i32
    %c0_i32_1 = arith.constant 0 : i32
    return %c0_i32, %c0_i32_0 : i32, i32
  }
  func.func @transform_3(%arg0: i32) -> (i32, i32) {
    %c0_i32 = arith.constant 0 : i32
    %c0_i32_0 = arith.constant 0 : i32
    %c0_i32_1 = arith.constant 0 : i32
    return %c0_i32, %c0_i32_0 : i32, i32
  }
  func.func @transform_4(%arg0: i32) -> (i32, i32) {
    %c0_i32 = arith.constant 0 : i32
    %c0_i32_0 = arith.constant 0 : i32
    %c0_i32_1 = arith.constant 0 : i32
    return %c0_i32, %c0_i32_0 : i32, i32
  }
  func.func @transform_5(%arg0: i32) -> (i32, i32) {
    %c0_i32 = arith.constant 0 : i32
    %c0_i32_0 = arith.constant 0 : i32
    %c0_i32_1 = arith.constant 0 : i32
    return %c0_i32, %c0_i32_0 : i32, i32
  }
  func.func @transform_6(%arg0: i32) -> (i32, i32) {
    %c0_i32 = arith.constant 0 : i32
    %c0_i32_0 = arith.constant 0 : i32
    %c0_i32_1 = arith.constant 0 : i32
    return %c0_i32, %c0_i32_0 : i32, i32
  }
  func.func @transform_7(%arg0: i32) -> (i32, i32) {
    %c0_i32 = arith.constant 0 : i32
    %c0_i32_0 = arith.constant 0 : i32
    %c0_i32_1 = arith.constant 0 : i32
    return %c0_i32, %c0_i32_0 : i32, i32
  }
  func.func @transform_8(%arg0: i32) -> (i32, i32) {
    %c0_i32 = arith.constant 0 : i32
    %c0_i32_0 = arith.constant 0 : i32
    return %arg0, %c0_i32 : i32, i32
  }
}

</mosaic_0001>

<bundles_post_ra>
// kernel: deepgbm_forward.1
= control target key start
LH: loop header
LB: loop body
LE: loop exit
PB: predicated region body
PF: predicated region fallthrough
CT: control target
= control target key end

     0   :  { %13 = vsyncpa [#allocation3], 0  ;;  %s1134_s27 = smov 0   ;;  %s1285_s0 = inlined_call_operand.vmem [shape: f32[1,4], index: 0, kind: input, shape index: {}]   ;;  %s1286_s1 = inlined_call_operand.vmem [shape: bf16[64,56], index: 1, kind: input, shape index: {}]   ;;  %s1287_s2 = inlined_call_operand.vmem [shape: bf16[56,69], index: 2, kind: input, shape index: {}]   ;;  %s1288_s3 = inlined_call_operand.vmem [shape: f32[1,64], index: 3, kind: input, shape index: {}]   ;;  %s1289_s4 = inlined_call_operand.vmem [shape: bf16[64,64], index: 4, kind: input, shape index: {}]   ;;  %s1290_s5 = inlined_call_operand.vmem [shape: f32[1,64], index: 5, kind: input, shape index: {}]   ;;  %s1291_s6 = inlined_call_operand.vmem [shape: bf16[64,64], index: 6, kind: input, shape index: {}]   ;;  %s1292_s7 = inlined_call_operand.vmem [shape: f32[1,64], index: 7, kind: input, shape index: {}]   ;;  %s1293_s8 = inlined_call_operand.vmem [shape: f32[64,64], index: 8, kind: output, shape index: {}]  }
   0x1 LB: > { %s901_s28 = sadd.s32 4294967295, %s1081_s27   ;;  %p903_p0 = scmp.ge.s32.totalorder %s1081_s27, 1  ;;  %s1081_s27 = sphi %s1134_s27, %s19_s27  }
   0x2   : > { %p223_p1 = scmp.lt.s32.totalorder %s1081_s27, 3  ;;  %s236_s9 = sshll.u32 %s1285_s0, 4  ;;  %s237_s9 = int_to_ptr.vmem [resolvable:$true] %s236_s9 }
   0x3   : > { %p1149_p3 = scmp.eq.s32.totalorder %s901_s28, 0  ;;  %s1056_s12 = scalar_lea.vmem %s237_s9, 16 }
   0x4   : > { %p1145_p2 = pnand %p903_p0, %p223_p1  ;;  %p1057_p6 = scmp.ne.s32.totalorder %s237_s9, %s1056_s12 }
   0x5   : > { %p1064_p10 = scmp.lt.s32.totalorder %s237_s9, %s237_s9  ;;  %p1065_p11 = scmp.lt.s32.totalorder %s1056_s12, %s1056_s12 }
   0x6   : > { %p1002_p4 = pneg %p1145_p2 }
   0x7   : > { %p1066_p12 = por %p1065_p11, %p1064_p10 }
   0x8   : > { %p1003_p5 = pnand %p1149_p3, %p1002_p4 }
   0xa   : > { %p1058_p7 = pneg %p1003_p5 }
   0xc   : > { %p1059_p8 = pnand %p1058_p7, %p1057_p6 }
   0xe   : > { %p1060_p9 = pneg %p1059_p8 }
  0x10   : > { %p1067_p13 = pnand %p1066_p12, %p1060_p9 }
  0x12   : > { %1070 = shalt.err (!%p1067_p13)
}
  0x13   : > { %s1083_s13 = smov [#allocation2]   ;;  %276 = sbr.rel (%p1145_p2) target bundleno = 1107 (0x453), region = 52 }
  0x14   : > { %1005 = dma.vmem_to_smem (!%p1003_p5), %s237_s9, 16, %s1083_s13, [#allocation3]  }
  0x1a   : > { %1076 = dma.done.wait (%p1149_p3), [#allocation3], 16  }
  0x1b   : > { %1078 = vsyncadd (%p1149_p3), [#allocation3], 4294967280 }
  0x1c   : > { %282 = sfence }
  0x1d   : > { %v1024_v0 = vld [vmem:[%s1287_s2] sm:$0xff]   ;;  %v1025_v1 = vld [vmem:[%s1287_s2 + $0x8] sm:$0xff]   ;;  %s908_s18 = sshll.u32 %s901_s28, 2  ;;  %v1026_v2 = vld [vmem:[%s1287_s2 + $0x10] sm:$0xff]   ;;  %vm373_vm0 = vcmask 1043456   ;;  %vm366_vm1 = vcmask 457728  }
  0x1e   : > { %961 = vmatprep.subr.bf16.mxu0 %v1024_v0  ;;  %p312_p0 = scmp.lt.s32.totalorder %s908_s18, 7  ;;  %v1030_v3 = vld [vmem:[%s1289_s4] sm:$0xff]   ;;  %v1031_v4 = vld [vmem:[%s1289_s4 + $0x8] sm:$0xff]   ;;  %v1027_v5 = vld [vmem:[%s1287_s2 + $0x18] ss:$0 sps:$4 sm:$0xff]   ;;  %s1084_s10 = smov 112  }
  0x1f   : > { %962 = vmatpush3.bf16.msra.mxu0 %v1024_v0  ;;  %973 = vmatprep.subr.bf16.mxu1 %v1030_v3  ;;  %v375_v13 = vsel %vm373_vm0, %v1027_v5, 0  ;;  %v1032_v15 = vld [vmem:[%s1289_s4 + $0x10] sm:$0xff]   ;;  %v1033_v16 = vld [vmem:[%s1289_s4 + $0x18] sm:$0xff]   ;;  %v920_v17 = vld [vmem:[%s1288_s3] ss:$0 sm:$0xff]  ;;  %s1085_s17 = smov 64  }
  0x20   : > { %963 = vmatprep.subr.bf16.mxu0 %v1025_v1  ;;  %s1297_s18 = smov (!%p312_p0, %s908_s18), 7  ;;  %974 = vmatpush3.bf16.msra.mxu1 %v1030_v3  ;;  %v1034_v28 = vld [vmem:[%s1291_s6] sm:$0xff]   ;;  %v1035_v29 = vld [vmem:[%s1291_s6 + $0x8] sm:$0xff]   ;;  %vm482_vm2 = vcmask 523264   ;;  %vm662_vm3 = vcmask 261120   ;;  %v1036_v46 = vld [vmem:[%s1291_s6 + $0x10] sm:$0xff]  }
  0x21   : > { %s909_s28 = sshll.u32 %s1297_s18, 2  ;;  %975 = vmatprep.subr.bf16.mxu1 %v1031_v4  ;;  %v1037_v47 = vld [vmem:[%s1291_s6 + $0x18] sm:$0xff]   ;;  %vm695_vm4 = vcmask 31744   ;;  %v921_v58 = vld [vmem:[%s1290_s5] ss:$0 sm:$0xff]  ;;  %s936_s11 = sld [smem:[#allocation2 + $0x2]] }
  0x22   : > { %s315_s9 = scalar_lea.vmem %s1286_s1, %s909_s28  ;;  %s935_s12 = sld [smem:[#allocation2 + $0x1]] }
  0x23   : > { %964 = vmatpush3.bf16.msra.mxu0 %v1025_v1  ;;  %v324_v6 = vld [vmem:[%s315_s9] sm:$0xff]   ;;  %v326_v7 = vld [vmem:[%s315_s9 + $0x8] sm:$0xff]   ;;  %s1087_s13 = smov 92   ;;  %s716_s14 = sld [smem:[#allocation2]] }
  0x24   : > { %965 = vmatprep.subr.bf16.mxu0 %v1026_v2  ;;  %v638_v8 = vunpack.c.l.bf16 %v324_v6  ;;  %v639_v9 = vunpack.c.h.bf16 %v324_v6  ;;  %976 = vmatpush3.bf16.msra.mxu1 %v1031_v4  ;;  %v640_v10 = vunpack.c.l.bf16 %v326_v7  ;;  %v641_v19 = vunpack.c.h.bf16 %v326_v7  ;;  %s911_s15 = sshll.u32 %s1297_s18, 3 }
  0x25   : > { %969 = vmatprep.mubr.msk.bf16.mxu0 %vm366_vm1, %v324_v6  ;;  %977 = vmatprep.subr.bf16.mxu1 %v1032_v15  ;;  %s321_s19 = scalar_lea.vmem %s1293_s8, %s911_s15 }
  0x26   : > { %v642_v11 = vmul.f32 %v638_v8, %v638_v8  ;;  %v643_v12 = vmul.f32 %v639_v9, %v639_v9  ;;  %v644_v14 = vmul.f32 %v640_v10, %v640_v10  ;;  %v645_v32 = vmul.f32 %v641_v19, %v641_v19  ;;  %v928_v9 = vld [vmem:[%s1292_s7] ss:$0 sm:$0xff] }
  0x27   : > { %966 = vmatpush3.bf16.msra.mxu0 %v1026_v2 }
  0x28   : > { %997 = vmatprep.subr.msk.bf16.mxu0 %vm373_vm0, %v1027_v5  ;;  %650 = vrot.lane.b32.xlu0 %v642_v11, %s1084_s10 }
  0x29   : > { %652 = vrot.lane.b32.xlu1 %v643_v12, %s1084_s10  ;;  %978 = vmatpush3.bf16.msra.mxu1 %v1032_v15 }
  0x2a   : > { %979 = vmatprep.subr.bf16.mxu1 %v1033_v16 }
  0x2b   : > { %968 = vmatpush3.bf16.msra.mxu0 %v375_v13 }
  0x2c   : > { %654 = vrot.lane.b32.xlu0 %v644_v14, %s1084_s10  ;;  %985 = vmatprep.subr.bf16.mxu0 %v1034_v28 }
  0x2d   : > { %980 = vmatpush3.bf16.msra.mxu1 %v1033_v16 }
  0x2e   : > { %970 = vmatmul.mubr.msk.bf16.vlgmr.msra.gmra.mrb[0].mxu0 %vm366_vm1, %v326_v7 }
  0x2f   : > { %986 = vmatpush3.bf16.msra.mxu0 %v1034_v28 }
  0x30   : > { %987 = vmatprep.subr.bf16.mxu0 %v1035_v29 }
  0x33   : > { %988 = vmatpush3.bf16.msra.mxu0 %v1035_v29 }
  0x34   : > { %989 = vmatprep.subr.bf16.mxu0 %v1036_v46 }
  0x37   : > { %990 = vmatpush3.bf16.msra.mxu0 %v1036_v46 }
  0x38   : > { %991 = vmatprep.subr.bf16.mxu0 %v1037_v47 }
  0x3b   : > { %992 = vmatpush3.bf16.msra.mxu0 %v1037_v47 }
  0x9a   : > { %v651_v40 = vpop.permute.xlu0 %650 }
  0x9b   : > { %v663_v41 = vsel %vm662_vm3, %v651_v40, 0.0  ;;  %v653_v42 = vpop.permute.xlu1 %652 }
  0x9c   : > { %v666_v43 = vsel %vm662_vm3, %v653_v42, 0.0 }
  0x9e   : > { %v655_v44 = vpop.permute.xlu0 %654 }
  0x9f   : > { %v669_v45 = vsel %vm662_vm3, %v655_v44, 0.0 }
 0x101   : > { %v1203_v18 = vpop.f32.mrb[0].mxu0 }
 0x102   : > { %v435_v20 = vadd.f32 %v1203_v18, %v920_v17  ;;  %v677_v21 = vmul.f32 %v1203_v18, %v1203_v18  ;;  %v1208_v22 = vpop.f32.mrb[1].mxu0 }
 0x103   : > { %v433_v23 = vadd.f32 %v920_v17, %v1208_v22  ;;  %v675_v24 = vmul.f32 %v1208_v22, %v1208_v22  ;;  %v1213_v25 = vpop.f32.mrb[2].mxu0 }
 0x104   : > { %v436_v26 = vadd.f32 %v1213_v25, %v920_v17  ;;  %687 = vrot.lane.b32.xlu1 %v677_v21, %s1085_s17  ;;  %v1216_v27 = vpop.f32.mrb[3].mxu0  ;;  %v439_v33 = vmax.f32 %v435_v20, 0.0  ;;  %v678_v39 = vmul.f32 %v1213_v25, %v1213_v25 }
 0x105   : > { %v434_v30 = vadd.f32 %v920_v17, %v1216_v27  ;;  %v676_v31 = vmul.f32 %v1216_v27, %v1216_v27  ;;  %683 = vrot.lane.b32.xlu0 %v675_v24, %s1085_s17  ;;  %v437_v35 = vmax.f32 %v433_v23, 0.0 }
 0x106   : > { %v440_v34 = vmax.f32 %v436_v26, 0.0 }
 0x107   : > { %v438_v36 = vmax.f32 %v434_v30, 0.0 }
 0x108   : > { %v442_v37 = vpack.c.bf16 %v440_v34, %v439_v33  ;;  %685 = vrot.lane.b32.xlu1 %v676_v31, %s1085_s17 }
 0x109   : > { %656 = vrot.lane.b32.xlu0 %v645_v32, %s1084_s10  ;;  %v441_v38 = vpack.c.bf16 %v438_v36, %v437_v35  ;;  %s1086_s10 = smov 35  }
 0x10b   : > { %981 = vmatprep.mubr.msk.bf16.mxu1 %vm482_vm2, %v441_v38  ;;  %v748_v38 = vstv %s936_s11 }
 0x10c   : > { %689 = vrot.lane.b32.xlu1 %v678_v39, %s1085_s17  ;;  %982 = vmatmul.mubr.msk.bf16.vlgmr.msra.gmra.mrb[0].mxu1 %vm482_vm2, %v442_v37 }
 0x128   : > { %664 = vadd.xlane.f32.xlu0 %v663_v41 }
 0x12c   : > { %667 = vadd.xlane.f32.xlu0 %v666_v43  ;;  %v753_v43 = vstv %s935_s12 }
 0x130   : > { %670 = vadd.xlane.f32.xlu1 %v669_v45 }
 0x176   : > { %v688_v48 = vpop.permute.xlu1 %687 }
 0x177   : > { %v684_v49 = vpop.permute.xlu0 %683  ;;  %v702_v50 = vsel %vm695_vm4, %v688_v48, 0.0 }
 0x178   : > { %703 = vadd.xlane.f32.xlu0 %v702_v50  ;;  %v696_v56 = vsel %vm695_vm4, %v684_v49, 0.0 }
 0x17a   : > { %v686_v51 = vpop.permute.xlu1 %685 }
 0x17b   : > { %v657_v52 = vpop.permute.xlu0 %656  ;;  %v699_v57 = vsel %vm695_vm4, %v686_v51, 0.0 }
 0x17c   : > { %v672_v53 = vsel %vm662_vm3, %v657_v52, 0.0 }
 0x17d   : > { %673 = vadd.xlane.f32.xlu1 %v672_v53 }
 0x17e   : > { %v690_v54 = vpop.permute.xlu1 %689 }
 0x17f   : > { %v705_v55 = vsel %vm695_vm4, %v690_v54, 0.0 }
 0x180   : > { %706 = vadd.xlane.f32.xlu0 %v705_v55 }
 0x181   : > { %697 = vadd.xlane.f32.xlu1 %v696_v56 }
 0x184   : > { %700 = vadd.xlane.f32.xlu0 %v699_v57 }
 0x1b5   : > { %v665_v19 = vpop.xlane.xlu0 %664 }
 0x1b9   : > { %v668_v20 = vpop.xlane.xlu0 %667 }
 0x1bd   : > { %v671_v21 = vpop.xlane.xlu1 %670 }
 0x1df   : > { %v983_v59 = vpop.f32.mrb[0].mxu1 }
 0x1e0   : > { %v532_v60 = vadd.f32 %v983_v59, %v921_v58  ;;  %v523_v61 = vpop.f32.mrb[1].mxu1 }
 0x1e1   : > { %v524_v62 = vadd.f32 %v921_v58, %v523_v61  ;;  %v984_v63 = vpop.f32.mrb[2].mxu1 }
 0x1e2   : > { %v535_v0 = vadd.f32 %v984_v63, %v921_v58  ;;  %v526_v1 = vpop.f32.mrb[3].mxu1  ;;  %v540_v3 = vmax.f32 %v532_v60, 0.0 }
 0x1e3   : > { %v527_v2 = vadd.f32 %v921_v58, %v526_v1  ;;  %v538_v5 = vmax.f32 %v524_v62, 0.0  ;;  %v1088_v58 = vmov 32  }
 0x1e4   : > { %v541_v4 = vmax.f32 %v535_v0, 0.0  ;;  %1022 = vset.pattern.permute.xlu0 %v1088_v58  ;;  %1023 = vset.pattern.permute.xlu1 %v1088_v58 }
 0x1e5   : > { %v539_v6 = vmax.f32 %v527_v2, 0.0 }
 0x1e6   : > { %v543_v7 = vpack.c.bf16 %v541_v4, %v540_v3 }
 0x1e7   : > { %v542_v8 = vpack.c.bf16 %v539_v6, %v538_v5 }
 0x1e9   : > { %993 = vmatprep.mubr.msk.bf16.mxu0 %vm482_vm2, %v542_v8 }
 0x1ea   : > { %994 = vmatmul.mubr.msk.bf16.vlgmr.msra.gmra.mrb[4].mxu0 %vm482_vm2, %v543_v7 }
 0x205   : > { %v704_v23 = vpop.xlane.xlu0 %703 }
 0x206   : > { %v710_v32 = vsub.f32 %v704_v23, %v671_v21 }
 0x208   : > { %v714_v35 = vmul.f32 0.5, %v710_v32 }
 0x20a   : > { %v674_v24 = vpop.xlane.xlu1 %673  ;;  %v726_v47 = vadd.f32 %v1203_v18, %v714_v35  ;;  %v719_v18 = vstv %s716_s14 }
 0x20d   : > { %v707_v26 = vpop.xlane.xlu0 %706 }
 0x20e   : > { %v698_v28 = vpop.xlane.xlu1 %697  ;;  %v711_v36 = vsub.f32 %v707_v26, %v674_v24 }
 0x20f   : > { %v708_v30 = vsub.f32 %v698_v28, %v665_v19 }
 0x210   : > { %v715_v44 = vmul.f32 0.5, %v711_v36 }
 0x211   : > { %v701_v29 = vpop.xlane.xlu0 %700  ;;  %v712_v33 = vmul.f32 0.5, %v708_v30  ;;  %v802_v30 = vlaneseq }
 0x212   : > { %v709_v31 = vsub.f32 %v701_v29, %v668_v20 }
 0x213   : > { %v724_v37 = vadd.f32 %v712_v33, %v1208_v22  ;;  %v727_v22 = vadd.f32 %v1213_v25, %v715_v44 }
 0x214   : > { %v713_v34 = vmul.f32 0.5, %v709_v31  ;;  %v803_v31 = vand.u32 127, %v802_v30 }
 0x216   : > { %v725_v41 = vadd.f32 %v713_v34, %v1216_v27  ;;  %vm804_vm5 = vcmp.eq.s32.totalorder %v803_v31, 32 }
 0x2bd   : > { %v995_v10 = vpop.f32.mrb[4].mxu0 }
 0x2be   : > { %v623_v11 = vpop.f32.mrb[5].mxu0  ;;  %v1255_v16 = vadd.f32 %v995_v10, %v928_v9 }
 0x2bf   : > { %v1250_v12 = vadd.f32 %v928_v9, %v623_v11  ;;  %v996_v13 = vpop.f32.mrb[6].mxu0 }
 0x2c0   : > { %v626_v14 = vpop.f32.mrb[7].mxu0  ;;  %v1259_v17 = vadd.f32 %v996_v13, %v928_v9  ;;  %v722_v1 = vmul.f32 %v719_v18, %v1255_v16 }
 0x2c1   : > { %v1252_v15 = vadd.f32 %v928_v9, %v626_v14  ;;  %732 = vrot.lane.b32.xlu1 %v1250_v12, %s1086_s10  ;;  %v720_v59 = vmul.f32 %v719_v18, %v1250_v12 }
 0x2c2   : > { %v723_v6 = vmul.f32 %v719_v18, %v1259_v17 }
 0x2c3   : > { %734 = vrot.lane.b32.xlu0 %v1252_v15, %s1086_s10  ;;  %v721_v25 = vmul.f32 %v719_v18, %v1252_v15 }
 0x2c5   : > { %736 = vrot.lane.b32.xlu1 %v1255_v16, %s1086_s10 }
 0x2c9   : > { %738 = vrot.lane.b32.xlu1 %v1259_v17, %s1086_s10 }
 0x333   : > { %v733_v39 = vpop.permute.xlu1 %732 }
 0x334   : > { %v744_v40 = vadd.f32 %v733_v39, %v724_v37 }
 0x335   : > { %v735_v42 = vpop.permute.xlu0 %734 }
 0x336   : > { %v749_v45 = vadd.f32 %v748_v38, %v744_v40  ;;  %v745_v46 = vadd.f32 %v735_v42, %v725_v41 }
 0x337   : > { %v737_v48 = vpop.permute.xlu1 %736 }
 0x338   : > { %v750_v49 = vadd.f32 %v748_v38, %v745_v46  ;;  %v746_v50 = vadd.f32 %v737_v48, %v726_v47  ;;  %v754_v51 = vmul.f32 %v753_v43, %v749_v45 }
 0x33a   : > { %v751_v52 = vadd.f32 %v748_v38, %v746_v50  ;;  %762 = vrot.lane.b32.xlu0 %v754_v51, %s1087_s13  ;;  %v755_v53 = vmul.f32 %v753_v43, %v750_v49 }
 0x33b   : > { %v739_v54 = vpop.permute.xlu1 %738 }
 0x33c   : > { %v747_v55 = vadd.f32 %v739_v54, %v727_v22  ;;  %764 = vrot.lane.b32.xlu1 %v755_v53, %s1087_s13  ;;  %v756_v27 = vmul.f32 %v753_v43, %v751_v52 }
 0x33e   : > { %v752_v56 = vadd.f32 %v748_v38, %v747_v55  ;;  %766 = vrot.lane.b32.xlu0 %v756_v27, %s1087_s13 }
 0x340   : > { %v757_v57 = vmul.f32 %v753_v43, %v752_v56 }
 0x342   : > { %768 = vrot.lane.b32.xlu1 %v757_v57, %s1087_s13 }
 0x3ac   : > { %v763_v60 = vpop.permute.xlu0 %762 }
 0x3ad   : > { %v774_v61 = vadd.f32 %v763_v60, %v720_v59 }
 0x3ae   : > { %v765_v62 = vpop.permute.xlu1 %764 }
 0x3af   : > { %v937_v63 = vmul.f32 -1.442695, %v774_v61  ;;  %v775_v0 = vadd.f32 %v765_v62, %v721_v25 }
 0x3b0   : > { %v767_v2 = vpop.permute.xlu0 %766 }
 0x3b1   : > { %1040 = vpow2.f32 %v937_v63  ;;  %v938_v3 = vmul.f32 -1.442695, %v775_v0  ;;  %v776_v4 = vadd.f32 %v767_v2, %v722_v1 }
 0x3b3   : > { %1042 = vpow2.f32 %v938_v3  ;;  %v939_v5 = vmul.f32 -1.442695, %v776_v4 }
 0x3b4   : > { %v769_v7 = vpop.permute.xlu1 %768 }
 0x3b5   : > { %1044 = vpow2.f32 %v939_v5  ;;  %v777_v8 = vadd.f32 %v769_v7, %v723_v6 }
 0x3b7   : > { %v940_v9 = vmul.f32 -1.442695, %v777_v8 }
 0x3b9   : > { %1046 = vpow2.f32 %v940_v9 }
 0x3bb   : > { %v1041_v10 = vpop.eup %1040 }
 0x3bc   : > { %v790_v11 = vadd.f32 1.0, %v1041_v10 }
 0x3bd   : > { %v1043_v13 = vpop.eup %1042 }
 0x3be   : > { %1048 = vrcp.f32 %v790_v11  ;;  %v791_v14 = vadd.f32 1.0, %v1043_v13 }
 0x3bf   : > { %v1045_v19 = vpop.eup %1044 }
 0x3c0   : > { %1050 = vrcp.f32 %v791_v14  ;;  %v792_v20 = vadd.f32 1.0, %v1045_v19 }
 0x3c2   : > { %1052 = vrcp.f32 %v792_v20 }
 0x3c3   : > { %v1047_v21 = vpop.eup %1046 }
 0x3c4   : > { %v793_v23 = vadd.f32 1.0, %v1047_v21 }
 0x3c6   : > { %1054 = vrcp.f32 %v793_v23 }
 0x3c8   : > { %v1049_v24 = vpop.eup %1048 }
 0x3c9   : > { %807 = vperm.xlu0 %1022, %v1049_v24  }
 0x3ca   : > { %v1051_v26 = vpop.eup %1050 }
 0x3cb   : > { %812 = vperm.xlu1 %1023, %v1051_v26  }
 0x3cc   : > { %v1053_v28 = vpop.eup %1052 }
 0x3cf   : > { %817 = vperm.xlu1 %1023, %v1053_v28  }
 0x3d0   : > { %v1055_v29 = vpop.eup %1054 }
 0x3d1   : > { %822 = vperm.xlu0 %1022, %v1055_v29  }
 0x448   : > { %v808_v32 = vpop.permute.xlu0 %807 }
 0x449   : > { %v825_v33 = vsel %vm804_vm5, %v808_v32, %v1250_v12 }
 0x44a   : > { %829 = vst.msk [vmem:[%s321_s19] sm:$0xff] %vm482_vm2, %v825_v33  ;;  %v813_v34 = vpop.permute.xlu1 %812 }
 0x44b   : > { %v826_v35 = vsel %vm804_vm5, %v813_v34, %v1252_v15 }
 0x44c   : > { %830 = vst.msk [vmem:[%s321_s19 + $0x8] sm:$0xff] %vm482_vm2, %v826_v35 }
 0x44e   : > { %v818_v36 = vpop.permute.xlu1 %817 }
 0x44f   : > { %v827_v37 = vsel %vm804_vm5, %v818_v36, %v1255_v16 }
 0x450   : > { %831 = vst.msk [vmem:[%s321_s19 + $0x10] sm:$0xff] %vm482_vm2, %v827_v37  ;;  %v823_v38 = vpop.permute.xlu0 %822 }
 0x451   : > { %v828_v39 = vsel %vm804_vm5, %v823_v38, %v1259_v17 }
 0x452   : > { %832 = vst.msk [vmem:[%s321_s19 + $0x18] sm:$0xff] %vm482_vm2, %v828_v39 }
 0x453 PF: > { %s19_s27 = sadd.s32 1, %s1081_s27  }
 0x454   : > { %p16_p1 = scmp.ge.s32.totalorder %s19_s27, 4  }
 0x456   :  { %18 = sbr.rel (!%p16_p1) target bundleno = 1 (0x1), region = 87 }
 0x45d   :  { %855 = vsyncpa [#allocation3], 1 }
 0x45e   :  { %857 = vsyncpa [#allocation3 + $0x1], 1 }

</bundles_post_ra>
